<compile_context>
chip_gen: v7x
topology: tpu7x:2x2x1
jax: 0.10.0
libtpu: 0.0.40
codegen_flags: <defaults>
</compile_context>

<pallas_src>
import math

import jax
import jax.numpy as jnp
from jax.experimental import pallas as pl
from jax.experimental.pallas import tpu as pltpu

LN_EPS = 1e-5


def _round_up(a, b):
    return ((a + b - 1) // b) * b


def _sublane(dtype):
    # sublane packing: 8 rows for 4-byte, 16 for 2-byte, 32 for 1-byte dtypes
    return max(8, 32 // jnp.dtype(dtype).itemsize)


def _vmem_capacity_bytes():
    try:
        return int(pltpu.get_tpu_info().vmem_capacity_bytes)
    except Exception:  # interpret mode / older runtime: assume 128 MiB parts
        return 128 << 20


def _footprint_bytes(tm, tk, kt, d_model, x_it, w_it, o_it):
    """Estimated VMEM working set for one pipelined grid step."""
    n_wbuf = 1 if kt == 1 else 2              # Buffered(1) when weights resident
    weights = n_wbuf * 2 * d_model * tk * w_it        # W1 chunk + W2 chunk
    tiles = 2 * tm * d_model * (x_it + o_it)          # double-buffered x / out
    acc = tm * d_model * 4                            # f32 accumulator scratch
    interm = tm * tk * 4 + 2 * tm * d_model * 4       # h + f32 temporaries
    return int((weights + tiles + acc + interm) * 1.15) + (2 << 20)


def _choose_tk(d_ff, d_model, tm, x_it, w_it, o_it, budget):
    """Largest d_ff chunk (d_ff itself, or a multiple of 128 dividing d_ff)
    whose per-step working set fits the VMEM budget."""
    cands = [d_ff] + sorted(
        (k for k in range(128, d_ff, 128) if d_ff % k == 0), reverse=True)
    for tk in cands:
        if _footprint_bytes(tm, tk, d_ff // tk, d_model,
                            x_it, w_it, o_it) <= budget:
            return tk
    return cands[-1]


def _ffn_ln_kernel(nrows_ref, x_ref, w1_ref, w2_ref, o_ref, acc_ref):
    # grid = (row_tiles, d_ff_tiles); k is the d_ff reduction axis.
    # x_ref : [tm, d_model]          w1_ref: [d_model, tk]
    # w2_ref: [tk, d_model]          acc_ref: [tm, d_model] f32 scratch
    k = pl.program_id(1)

    @pl.when(k == 0)
    def _init():
        acc_ref[...] = jnp.zeros_like(acc_ref)

    # Mask rows past the true row count (only the last, partial row tile):
    # zeroed rows are numerically safe through matmul / ReLU / LayerNorm and
    # their out-of-bounds output rows are dropped by the boundary store.
    tm = x_ref.shape[0]
    rows = pl.program_id(0) * tm + jax.lax.broadcasted_iota(
        jnp.int32, (tm, 1), 0)
    x = jnp.where(rows < nrows_ref[0], x_ref[...], 0)

    # fc[0]: Linear(d_model -> d_ff, no bias) + fc[1]: ReLU, on this d_ff
    # chunk.  Feed the MXU the stored (bf16) dtype; accumulate in f32.
    h = jnp.dot(x.astype(w1_ref.dtype), w1_ref[...],
                preferred_element_type=jnp.float32)
    h = jnp.maximum(h, 0.0)

    # fc[2]: Linear(d_ff -> d_model, no bias), accumulated over d_ff chunks.
    acc_ref[...] += jnp.dot(h.astype(w2_ref.dtype), w2_ref[...],
                            preferred_element_type=jnp.float32)

    @pl.when(k == pl.num_programs(1) - 1)
    def _finalize():
        # residual add + LayerNorm(d_model) with gamma=1, beta=0, eps=1e-5
        y = acc_ref[...] + x_ref[...].astype(jnp.float32)
        mean = jnp.mean(y, axis=-1, keepdims=True)
        centered = y - mean
        var = jnp.mean(centered * centered, axis=-1, keepdims=True)
        o_ref[...] = (centered * jax.lax.rsqrt(var + LN_EPS)).astype(o_ref.dtype)


def poswise_ffn(x, w1, w2, *, tm=None, tk=None, mxu_dtype=jnp.bfloat16):
    """x: [batch, seq, d_model]; w1: [d_model, d_ff]; w2: [d_ff, d_model].

    mxu_dtype: dtype the weights (and matmul feeds) are cast to.  Default
    bf16 => native MXU rate with f32 accumulation (documented contract).
    Pass None to keep the stored weight dtype (tight f32 comparison path).
    """
    b, s, d_model = x.shape
    d_ff = w1.shape[1]
    m = b * s

    if mxu_dtype is not None:
        w1 = w1.astype(mxu_dtype)
        w2 = w2.astype(mxu_dtype)

    x2d = x.reshape(m, d_model)
    nrows = jnp.array([m], dtype=jnp.int32)

    cap = _vmem_capacity_bytes()
    budget = max(16 << 20, cap - (12 << 20))  # headroom for Mosaic scratch

    # Row tile: tall for the MXU, but >= 2 grid steps whenever the row count
    # allows so the "parallel" axis spans both v7x TensorCores.  Rounded to
    # the activation dtype's sublane packing.
    sub = _sublane(x.dtype)
    if tm is None:
        tm = 512 if cap > (100 << 20) else 256        # v5e/v6e : v7x
    tm_eff = max(sub, min(tm, _round_up(pl.cdiv(m, 2), sub)))
    grid_m = pl.cdiv(m, tm_eff)

    x_it = jnp.dtype(x.dtype).itemsize
    w_it = jnp.dtype(w1.dtype).itemsize
    o_it = x_it
    if tk is None:
        tk = _choose_tk(d_ff, d_model, tm_eff, x_it, w_it, o_it, budget)
    assert d_ff % tk == 0, "d_ff chunk must divide d_ff exactly"
    kt = d_ff // tk

    vmem_limit = int(max(32 << 20,
                         min(_footprint_bytes(tm_eff, tk, kt, d_model,
                                              x_it, w_it, o_it), budget)))

    cost = pl.CostEstimate(
        flops=4 * m * d_model * d_ff,                 # two matmuls
        transcendentals=m,                            # one rsqrt per row
        bytes_accessed=(2 * m * d_model * x_it
                        + w1.size * w_it + w2.size * w_it),
    )

    def _call(single_buffer_weights):
        if single_buffer_weights:
            # constant index_map across the grid => a second pipeline buffer
            # would be a dead copy; keep a single resident buffer.
            w1_spec = pl.BlockSpec((d_model, tk), lambda i, k, n: (0, k),
                                   pipeline_mode=pl.Buffered(1))
            w2_spec = pl.BlockSpec((tk, d_model), lambda i, k, n: (k, 0),
                                   pipeline_mode=pl.Buffered(1))
        else:
            w1_spec = pl.BlockSpec((d_model, tk), lambda i, k, n: (0, k))
            w2_spec = pl.BlockSpec((tk, d_model), lambda i, k, n: (k, 0))
        return pl.pallas_call(
            _ffn_ln_kernel,
            out_shape=jax.ShapeDtypeStruct((m, d_model), x.dtype),
            grid_spec=pltpu.PrefetchScalarGridSpec(
                num_scalar_prefetch=1,
                grid=(grid_m, kt),
                in_specs=[
                    pl.BlockSpec((tm_eff, d_model), lambda i, k, n: (i, 0)),
                    w1_spec,
                    w2_spec,
                ],
                out_specs=pl.BlockSpec((tm_eff, d_model),
                                       lambda i, k, n: (i, 0)),
                scratch_shapes=[pltpu.VMEM((tm_eff, d_model), jnp.float32)],
            ),
            compiler_params=pltpu.CompilerParams(
                dimension_semantics=("parallel", "arbitrary"),
                vmem_limit_bytes=vmem_limit,
            ),
            cost_estimate=cost,
        )(nrows, x2d, w1, w2)

    use_single_buffer = (kt == 1)
    try:
        out2d = _call(use_single_buffer)
    except Exception:
        if not use_single_buffer:
            raise
        # Fallback if this Pallas build rejects Buffered(1) weight specs.
        out2d = _call(False)

    return out2d.reshape(b, s, d_model)


def _reference(x, w1, w2):
    x32 = x.astype(jnp.float32)
    h = jnp.maximum(x32 @ w1.astype(jnp.float32), 0.0)
    y = h @ w2.astype(jnp.float32) + x32
    mean = jnp.mean(y, axis=-1, keepdims=True)
    var = jnp.mean((y - mean) ** 2, axis=-1, keepdims=True)
    return ((y - mean) * jax.lax.rsqrt(var + LN_EPS)).astype(x.dtype)


if __name__ == "__main__":
    batch, seq_len, d_model, d_ff = 2, 8, 32, 64

    key = jax.random.PRNGKey(0)
    kx, k1, k2, kx2 = jax.random.split(key, 4)

    x = jax.random.normal(kx, (batch, seq_len, d_model), dtype=jnp.float32)
    # Deterministic synthetic weights (nn.Linear shapes, no bias), stored
    # pre-transposed so the kernel computes x @ W directly.
    bound1 = 1.0 / math.sqrt(d_model)
    bound2 = 1.0 / math.sqrt(d_ff)
    w1 = jax.random.uniform(k1, (d_model, d_ff), jnp.float32, -bound1, bound1)
    w2 = jax.random.uniform(k2, (d_ff, d_model), jnp.float32, -bound2, bound2)

    ref = _reference(x, w1, w2)

    # Stored-dtype (f32) MXU path: tight comparison against the f32 reference.
    out_f32 = poswise_ffn(x, w1, w2, mxu_dtype=None)
    jax.block_until_ready(out_f32)
    assert jnp.allclose(out_f32, ref, atol=1e-4, rtol=1e-4), \
        "mismatch vs reference (f32 path)"

    # Default bf16 MXU feed (f32 accumulation): looser tolerance vs f32 ref.
    out_bf16 = poswise_ffn(x, w1, w2)
    jax.block_until_ready(out_bf16)
    assert jnp.allclose(out_bf16, ref, atol=5e-2, rtol=5e-2), \
        "mismatch vs reference (bf16 MXU path)"

    # Ragged rows (batch*seq = 14): exercises the masked partial tail tile
    # (no host-side jnp.pad, no output slice copy).
    x_odd = jax.random.normal(kx2, (batch, 7, d_model), dtype=jnp.float32)
    out_odd = poswise_ffn(x_odd, w1, w2, mxu_dtype=None)
    jax.block_until_ready(out_odd)
    ref_odd = _reference(x_odd, w1, w2)
    assert jnp.allclose(out_odd, ref_odd, atol=1e-4, rtol=1e-4), \
        "mismatch vs reference (ragged tail)"

    print("KERNEL_OK")
</pallas_src>

<mosaic_0001>
module attributes {stable_mosaic.version = 11 : i64} {
  func.func @_ffn_ln_kernel(%arg0: i32, %arg1: i32, %arg2: memref<1xi32, #tpu.memory_space<smem>>, %arg3: memref<8x32xf32, #tpu.memory_space<vmem>>, %arg4: memref<32x64xf32, #tpu.memory_space<vmem>>, %arg5: memref<64x32xf32, #tpu.memory_space<vmem>>, %arg6: memref<8x32xf32, #tpu.memory_space<vmem>>, %arg7: memref<8x32xf32, #tpu.memory_space<vmem>>) attributes {dimension_semantics = [#tpu.dimension_semantics<parallel>, #tpu.dimension_semantics<arbitrary>], iteration_bounds = array<i64: 2, 1>, scalar_prefetch = 1 : i64, scratch_operands = 1 : i64, tpu.core_type = #tpu.core_type<tc>, window_params = [{transform_indices = @transform_0, window_bounds = array<i64: 8, 32>}, {pipeline_mode = #tpu.pipeline_mode<synchronous>, transform_indices = @transform_1, window_bounds = array<i64: 32, 64>}, {pipeline_mode = #tpu.pipeline_mode<synchronous>, transform_indices = @transform_2, window_bounds = array<i64: 64, 32>}, {transform_indices = @transform_3, window_bounds = array<i64: 8, 32>}]} {
    %c0_i32 = arith.constant 0 : i32
    %0 = arith.cmpi eq, %arg1, %c0_i32 : i32
    %1 = arith.extui %0 : i1 to i32
    %c0_i32_0 = arith.constant 0 : i32
    %2 = arith.cmpi ne, %1, %c0_i32_0 : i32
    scf.if %2 {
      %cst_16 = arith.constant 0.000000e+00 : f32
      %28 = vector.broadcast %cst_16 : f32 to vector<8x32xf32>
      %c0_17 = arith.constant 0 : index
      %c0_18 = arith.constant 0 : index
      %29 = vector.load %arg7[%c0_17, %c0_18] : memref<8x32xf32, #tpu.memory_space<vmem>>, vector<8x32xf32>
      tpu.vector_store %arg7[%c0_17, %c0_18], %28 {strides = array<i32>} : memref<8x32xf32, #tpu.memory_space<vmem>>, vector<8x32xf32>,
    } else {
    }
    %c8_i32 = arith.constant 8 : i32
    %3 = arith.muli %arg0, %c8_i32 : i32
    %4 = tpu.iota {dimensions = array<i32: 0>} : vector<8x1xi32>
    %5 = vector.broadcast %3 : i32 to vector<8x1xi32>
    %6 = arith.addi %5, %4 : vector<8x1xi32>
    %c0 = arith.constant 0 : index
    %7 = memref.load %arg2[%c0] : memref<1xi32, #tpu.memory_space<smem>>
    %8 = vector.broadcast %7 : i32 to vector<8x1xi32>
    %9 = arith.cmpi slt, %6, %8 : vector<8x1xi32>
    %c0_1 = arith.constant 0 : index
    %c0_2 = arith.constant 0 : index
    %10 = vector.load %arg3[%c0_1, %c0_2] : memref<8x32xf32, #tpu.memory_space<vmem>>, vector<8x32xf32>
    %c0_i32_3 = arith.constant 0 : i32
    %11 = arith.sitofp %c0_i32_3 : i32 to f32
    %12 = vector.shape_cast %9 : vector<8x1xi1> to vector<8x1xi1>
    %13 = vector.broadcast %12 : vector<8x1xi1> to vector<8x32xi1>
    %14 = vector.broadcast %11 : f32 to vector<8x32xf32>
    %15 = arith.select %13, %10, %14 : vector<8x32xi1>, vector<8x32xf32>
    %c0_4 = arith.constant 0 : index
    %c0_5 = arith.constant 0 : index
    %16 = vector.load %arg4[%c0_4, %c0_5] : memref<32x64xf32, #tpu.memory_space<vmem>>, vector<32x64xf32>
    %cst = arith.constant dense<0.000000e+00> : vector<8x64xf32>
    %17 = tpu.matmul %15, %16, %cst {dimension_numbers = #tpu.dot_dimension_numbers<[1], [0], [0], [1], [0, 0, 1, 1], [], []>} : vector<8x32xf32>, vector<32x64xf32>, vector<8x64xf32> -> vector<8x64xf32>
    %cst_6 = arith.constant 0.000000e+00 : f32
    %18 = vector.broadcast %cst_6 : f32 to vector<8x64xf32>
    %19 = arith.maximumf %17, %18 : vector<8x64xf32>
    %c0_7 = arith.constant 0 : index
    %c0_8 = arith.constant 0 : index
    %20 = vector.load %arg7[%c0_7, %c0_8] : memref<8x32xf32, #tpu.memory_space<vmem>>, vector<8x32xf32>
    %c0_9 = arith.constant 0 : index
    %c0_10 = arith.constant 0 : index
    %21 = vector.load %arg5[%c0_9, %c0_10] : memref<64x32xf32, #tpu.memory_space<vmem>>, vector<64x32xf32>
    %cst_11 = arith.constant dense<0.000000e+00> : vector<8x32xf32>
    %22 = tpu.matmul %19, %21, %cst_11 {dimension_numbers = #tpu.dot_dimension_numbers<[1], [0], [0], [1], [0, 0, 1, 1], [], []>} : vector<8x64xf32>, vector<64x32xf32>, vector<8x32xf32> -> vector<8x32xf32>
    %23 = arith.addf %20, %22 : vector<8x32xf32>
    %c0_12 = arith.constant 0 : index
    %c0_13 = arith.constant 0 : index
    %24 = vector.load %arg7[%c0_12, %c0_13] : memref<8x32xf32, #tpu.memory_space<vmem>>, vector<8x32xf32>
    tpu.vector_store %arg7[%c0_12, %c0_13], %23 {strides = array<i32>} : memref<8x32xf32, #tpu.memory_space<vmem>>, vector<8x32xf32>,
    %c0_i32_14 = arith.constant 0 : i32
    %25 = arith.cmpi eq, %arg1, %c0_i32_14 : i32
    %26 = arith.extui %25 : i1 to i32
    %c0_i32_15 = arith.constant 0 : i32
    %27 = arith.cmpi ne, %26, %c0_i32_15 : i32
    scf.if %27 {
      %c0_16 = arith.constant 0 : index
      %c0_17 = arith.constant 0 : index
      %28 = vector.load %arg7[%c0_16, %c0_17] : memref<8x32xf32, #tpu.memory_space<vmem>>, vector<8x32xf32>
      %c0_18 = arith.constant 0 : index
      %c0_19 = arith.constant 0 : index
      %29 = vector.load %arg3[%c0_18, %c0_19] : memref<8x32xf32, #tpu.memory_space<vmem>>, vector<8x32xf32>
      %30 = arith.addf %28, %29 : vector<8x32xf32>
      %cst_20 = arith.constant dense<0.000000e+00> : vector<8xf32>
      %31 = vector.multi_reduction <add>, %30, %cst_20 [1] : vector<8x32xf32> to vector<8xf32>
      %32 = vector.shape_cast %31 : vector<8xf32> to vector<8x1xf32>
      %cst_21 = arith.constant 3.200000e+01 : f32
      %33 = vector.broadcast %cst_21 : f32 to vector<8x1xf32>
      %34 = arith.divf %32, %33 : vector<8x1xf32>
      %35 = vector.broadcast %34 : vector<8x1xf32> to vector<8x32xf32>
      %36 = arith.subf %30, %35 : vector<8x32xf32>
      %37 = arith.mulf %36, %36 : vector<8x32xf32>
      %cst_22 = arith.constant dense<0.000000e+00> : vector<8xf32>
      %38 = vector.multi_reduction <add>, %37, %cst_22 [1] : vector<8x32xf32> to vector<8xf32>
      %39 = vector.shape_cast %38 : vector<8xf32> to vector<8x1xf32>
      %cst_23 = arith.constant 3.200000e+01 : f32
      %40 = vector.broadcast %cst_23 : f32 to vector<8x1xf32>
      %41 = arith.divf %39, %40 : vector<8x1xf32>
      %cst_24 = arith.constant 9.99999974E-6 : f32
      %42 = vector.broadcast %cst_24 : f32 to vector<8x1xf32>
      %43 = arith.addf %41, %42 : vector<8x1xf32>
      %44 = math.rsqrt %43 : vector<8x1xf32>
      %45 = vector.broadcast %44 : vector<8x1xf32> to vector<8x32xf32>
      %46 = arith.mulf %36, %45 : vector<8x32xf32>
      %c0_25 = arith.constant 0 : index
      %c0_26 = arith.constant 0 : index
      %47 = vector.load %arg6[%c0_25, %c0_26] : memref<8x32xf32, #tpu.memory_space<vmem>>, vector<8x32xf32>
      tpu.vector_store %arg6[%c0_25, %c0_26], %46 {strides = array<i32>} : memref<8x32xf32, #tpu.memory_space<vmem>>, vector<8x32xf32>,
    } else {
    }
    return
  }
  func.func @transform_0(%arg0: i32, %arg1: i32, %arg2: memref<1xi32, #tpu.memory_space<smem>>) -> (i32, i32) {
    %c0_i32 = arith.constant 0 : i32
    %c0_i32_0 = arith.constant 0 : i32
    return %arg0, %c0_i32 : i32, i32
  }
  func.func @transform_1(%arg0: i32, %arg1: i32, %arg2: memref<1xi32, #tpu.memory_space<smem>>) -> (i32, i32) {
    %c0_i32 = arith.constant 0 : i32
    %c0_i32_0 = arith.constant 0 : i32
    return %c0_i32, %arg1 : i32, i32
  }
  func.func @transform_2(%arg0: i32, %arg1: i32, %arg2: memref<1xi32, #tpu.memory_space<smem>>) -> (i32, i32) {
    %c0_i32 = arith.constant 0 : i32
    %c0_i32_0 = arith.constant 0 : i32
    return %arg1, %c0_i32 : i32, i32
  }
  func.func @transform_3(%arg0: i32, %arg1: i32, %arg2: memref<1xi32, #tpu.memory_space<smem>>) -> (i32, i32) {
    %c0_i32 = arith.constant 0 : i32
    %c0_i32_0 = arith.constant 0 : i32
    return %arg0, %c0_i32 : i32, i32
  }
}

module attributes {stable_mosaic.version = 11 : i64} {
  func.func @_ffn_ln_kernel(%arg0: i32, %arg1: i32, %arg2: memref<1xi32, #tpu.memory_space<smem>>, %arg3: memref<8x32xf32, #tpu.memory_space<vmem>>, %arg4: memref<32x64xf32, #tpu.memory_space<vmem>>, %arg5: memref<64x32xf32, #tpu.memory_space<vmem>>, %arg6: memref<8x32xf32, #tpu.memory_space<vmem>>, %arg7: memref<8x32xf32, #tpu.memory_space<vmem>>) attributes {dimension_semantics = [#tpu.dimension_semantics<parallel>, #tpu.dimension_semantics<arbitrary>], iteration_bounds = array<i64: 2, 1>, scalar_prefetch = 1 : i64, scratch_operands = 1 : i64, tpu.core_type = #tpu.core_type<tc>, window_params = [{transform_indices = @transform_0, window_bounds = array<i64: 8, 32>}, {transform_indices = @transform_1, window_bounds = array<i64: 32, 64>}, {transform_indices = @transform_2, window_bounds = array<i64: 64, 32>}, {transform_indices = @transform_3, window_bounds = array<i64: 8, 32>}]} {
    %c0_i32 = arith.constant 0 : i32
    %0 = arith.cmpi eq, %arg1, %c0_i32 : i32
    %1 = arith.extui %0 : i1 to i32
    %c0_i32_0 = arith.constant 0 : i32
    %2 = arith.cmpi ne, %1, %c0_i32_0 : i32
    scf.if %2 {
      %cst_16 = arith.constant 0.000000e+00 : f32
      %28 = vector.broadcast %cst_16 : f32 to vector<8x32xf32>
      %c0_17 = arith.constant 0 : index
      %c0_18 = arith.constant 0 : index
      %29 = vector.load %arg7[%c0_17, %c0_18] : memref<8x32xf32, #tpu.memory_space<vmem>>, vector<8x32xf32>
      tpu.vector_store %arg7[%c0_17, %c0_18], %28 {strides = array<i32>} : memref<8x32xf32, #tpu.memory_space<vmem>>, vector<8x32xf32>,
    } else {
    }
    %c8_i32 = arith.constant 8 : i32
    %3 = arith.muli %arg0, %c8_i32 : i32
    %4 = tpu.iota {dimensions = array<i32: 0>} : vector<8x1xi32>
    %5 = vector.broadcast %3 : i32 to vector<8x1xi32>
    %6 = arith.addi %5, %4 : vector<8x1xi32>
    %c0 = arith.constant 0 : index
    %7 = memref.load %arg2[%c0] : memref<1xi32, #tpu.memory_space<smem>>
    %8 = vector.broadcast %7 : i32 to vector<8x1xi32>
    %9 = arith.cmpi slt, %6, %8 : vector<8x1xi32>
    %c0_1 = arith.constant 0 : index
    %c0_2 = arith.constant 0 : index
    %10 = vector.load %arg3[%c0_1, %c0_2] : memref<8x32xf32, #tpu.memory_space<vmem>>, vector<8x32xf32>
    %c0_i32_3 = arith.constant 0 : i32
    %11 = arith.sitofp %c0_i32_3 : i32 to f32
    %12 = vector.shape_cast %9 : vector<8x1xi1> to vector<8x1xi1>
    %13 = vector.broadcast %12 : vector<8x1xi1> to vector<8x32xi1>
    %14 = vector.broadcast %11 : f32 to vector<8x32xf32>
    %15 = arith.select %13, %10, %14 : vector<8x32xi1>, vector<8x32xf32>
    %c0_4 = arith.constant 0 : index
    %c0_5 = arith.constant 0 : index
    %16 = vector.load %arg4[%c0_4, %c0_5] : memref<32x64xf32, #tpu.memory_space<vmem>>, vector<32x64xf32>
    %cst = arith.constant dense<0.000000e+00> : vector<8x64xf32>
    %17 = tpu.matmul %15, %16, %cst {dimension_numbers = #tpu.dot_dimension_numbers<[1], [0], [0], [1], [0, 0, 1, 1], [], []>} : vector<8x32xf32>, vector<32x64xf32>, vector<8x64xf32> -> vector<8x64xf32>
    %cst_6 = arith.constant 0.000000e+00 : f32
    %18 = vector.broadcast %cst_6 : f32 to vector<8x64xf32>
    %19 = arith.maximumf %17, %18 : vector<8x64xf32>
    %c0_7 = arith.constant 0 : index
    %c0_8 = arith.constant 0 : index
    %20 = vector.load %arg7[%c0_7, %c0_8] : memref<8x32xf32, #tpu.memory_space<vmem>>, vector<8x32xf32>
    %c0_9 = arith.constant 0 : index
    %c0_10 = arith.constant 0 : index
    %21 = vector.load %arg5[%c0_9, %c0_10] : memref<64x32xf32, #tpu.memory_space<vmem>>, vector<64x32xf32>
    %cst_11 = arith.constant dense<0.000000e+00> : vector<8x32xf32>
    %22 = tpu.matmul %19, %21, %cst_11 {dimension_numbers = #tpu.dot_dimension_numbers<[1], [0], [0], [1], [0, 0, 1, 1], [], []>} : vector<8x64xf32>, vector<64x32xf32>, vector<8x32xf32> -> vector<8x32xf32>
    %23 = arith.addf %20, %22 : vector<8x32xf32>
    %c0_12 = arith.constant 0 : index
    %c0_13 = arith.constant 0 : index
    %24 = vector.load %arg7[%c0_12, %c0_13] : memref<8x32xf32, #tpu.memory_space<vmem>>, vector<8x32xf32>
    tpu.vector_store %arg7[%c0_12, %c0_13], %23 {strides = array<i32>} : memref<8x32xf32, #tpu.memory_space<vmem>>, vector<8x32xf32>,
    %c0_i32_14 = arith.constant 0 : i32
    %25 = arith.cmpi eq, %arg1, %c0_i32_14 : i32
    %26 = arith.extui %25 : i1 to i32
    %c0_i32_15 = arith.constant 0 : i32
    %27 = arith.cmpi ne, %26, %c0_i32_15 : i32
    scf.if %27 {
      %c0_16 = arith.constant 0 : index
      %c0_17 = arith.constant 0 : index
      %28 = vector.load %arg7[%c0_16, %c0_17] : memref<8x32xf32, #tpu.memory_space<vmem>>, vector<8x32xf32>
      %c0_18 = arith.constant 0 : index
      %c0_19 = arith.constant 0 : index
      %29 = vector.load %arg3[%c0_18, %c0_19] : memref<8x32xf32, #tpu.memory_space<vmem>>, vector<8x32xf32>
      %30 = arith.addf %28, %29 : vector<8x32xf32>
      %cst_20 = arith.constant dense<0.000000e+00> : vector<8xf32>
      %31 = vector.multi_reduction <add>, %30, %cst_20 [1] : vector<8x32xf32> to vector<8xf32>
      %32 = vector.shape_cast %31 : vector<8xf32> to vector<8x1xf32>
      %cst_21 = arith.constant 3.200000e+01 : f32
      %33 = vector.broadcast %cst_21 : f32 to vector<8x1xf32>
      %34 = arith.divf %32, %33 : vector<8x1xf32>
      %35 = vector.broadcast %34 : vector<8x1xf32> to vector<8x32xf32>
      %36 = arith.subf %30, %35 : vector<8x32xf32>
      %37 = arith.mulf %36, %36 : vector<8x32xf32>
      %cst_22 = arith.constant dense<0.000000e+00> : vector<8xf32>
      %38 = vector.multi_reduction <add>, %37, %cst_22 [1] : vector<8x32xf32> to vector<8xf32>
      %39 = vector.shape_cast %38 : vector<8xf32> to vector<8x1xf32>
      %cst_23 = arith.constant 3.200000e+01 : f32
      %40 = vector.broadcast %cst_23 : f32 to vector<8x1xf32>
      %41 = arith.divf %39, %40 : vector<8x1xf32>
      %cst_24 = arith.constant 9.99999974E-6 : f32
      %42 = vector.broadcast %cst_24 : f32 to vector<8x1xf32>
      %43 = arith.addf %41, %42 : vector<8x1xf32>
      %44 = math.rsqrt %43 : vector<8x1xf32>
      %45 = vector.broadcast %44 : vector<8x1xf32> to vector<8x32xf32>
      %46 = arith.mulf %36, %45 : vector<8x32xf32>
      %c0_25 = arith.constant 0 : index
      %c0_26 = arith.constant 0 : index
      %47 = vector.load %arg6[%c0_25, %c0_26] : memref<8x32xf32, #tpu.memory_space<vmem>>, vector<8x32xf32>
      tpu.vector_store %arg6[%c0_25, %c0_26], %46 {strides = array<i32>} : memref<8x32xf32, #tpu.memory_space<vmem>>, vector<8x32xf32>,
    } else {
    }
    return
  }
  func.func @transform_0(%arg0: i32, %arg1: i32, %arg2: memref<1xi32, #tpu.memory_space<smem>>) -> (i32, i32) {
    %c0_i32 = arith.constant 0 : i32
    %c0_i32_0 = arith.constant 0 : i32
    return %arg0, %c0_i32 : i32, i32
  }
  func.func @transform_1(%arg0: i32, %arg1: i32, %arg2: memref<1xi32, #tpu.memory_space<smem>>) -> (i32, i32) {
    %c0_i32 = arith.constant 0 : i32
    %c0_i32_0 = arith.constant 0 : i32
    return %c0_i32, %arg1 : i32, i32
  }
  func.func @transform_2(%arg0: i32, %arg1: i32, %arg2: memref<1xi32, #tpu.memory_space<smem>>) -> (i32, i32) {
    %c0_i32 = arith.constant 0 : i32
    %c0_i32_0 = arith.constant 0 : i32
    return %arg1, %c0_i32 : i32, i32
  }
  func.func @transform_3(%arg0: i32, %arg1: i32, %arg2: memref<1xi32, #tpu.memory_space<smem>>) -> (i32, i32) {
    %c0_i32 = arith.constant 0 : i32
    %c0_i32_0 = arith.constant 0 : i32
    return %arg0, %c0_i32 : i32, i32
  }
}

</mosaic_0001>

<bundles_post_ra>
// kernel: tpu_custom_call.1
= control target key start
LH: loop header
LB: loop body
LE: loop exit
PB: predicated region body
PF: predicated region fallthrough
CT: control target
= control target key end

     0   :  { %s940_s0 = inlined_call_operand.<no memory space> [shape: s32[1], index: 0, kind: input, shape index: {}]   ;;  %s941_s1 = inlined_call_operand.vmem [shape: f32[16,32], index: 1, kind: input, shape index: {}]   ;;  %s942_s2 = inlined_call_operand.vmem [shape: f32[32,64], index: 2, kind: input, shape index: {}]   ;;  %s943_s3 = inlined_call_operand.vmem [shape: f32[64,32], index: 3, kind: input, shape index: {}]   ;;  %s944_s4 = inlined_call_operand.hbm [shape: f32[16,32], index: 4, kind: output, shape index: {}]  }
   0x1   :  { %9 = sst [smem:[#allocation4]] %s940_s0 }
   0x2   :  { %10 = vsyncpa [#allocation6], 0 }
   0x3   :  { %12 = vsyncpa [#allocation6 + $0x1], 0  ;;  %s783_s17 = smov 0   ;;  %s785_s18 = smov 0  }
   0x4   :  { %s787_s19 = smov 0   ;;  %s789_s20 = smov 0  }
   0x5   :  { %s791_s21 = smov 0   ;;  %s793_s22 = smov 0  }
   0x6 LB: > { %s533_s0 = sadd.s32 4294967295, %s749_s22   ;;  %s534_s23 = sadd.s32 4294967294, %s749_s22   ;;  %s749_s22 = sphi %s793_s22, %s18_s22   ;;  %s745_s21 = sphi %s791_s21, %s951_s21   ;;  %s741_s20 = sphi %s789_s20, %s950_s20   ;;  %s737_s19 = sphi %s787_s19, %s949_s19   ;;  %s733_s18 = sphi %s785_s18, %s948_s18   ;;  %s729_s17 = sphi %s783_s17, %s947_s17  }
   0x7   : > { %s30_s24 = sadd.s32 1, %s745_s21  ;;  %s115_s25 = sadd.s32 1, %s737_s19 }
   0x8   : > { %p32_p0 = scmp.ge.s32.totalorder %s30_s24, 2  ;;  %p125_p1 = scmp.ne.s32.totalorder %s737_s19, %s733_s18 }
   0x9   : > { %p126_p2 = scmp.eq.s32.totalorder %s533_s0, 1  ;;  %p131_p3 = scmp.ne.s32.totalorder %s733_s18, %s729_s17 }
   0xa   : > { %s953_s24 = smov (%p32_p0, %s30_s24), 0  ;;  %p132_p5 = scmp.eq.s32.totalorder %s534_s23, 1 }
   0xb   : > { %p823_p4 = por %p126_p2, %p125_p1  ;;  %s112_s27 = ssub.s32 %s745_s21, %s953_s24 }
   0xc   : > { %p539_p6 = scmp.ge.s32.totalorder %s749_s22, 1  ;;  %p113_p7 = scmp.eq.s32.totalorder %s112_s27, 0 }
   0xd   : > { %p830_p8 = por %p132_p5, %p131_p3  ;;  %p173_p9 = scmp.lt.s32.totalorder %s749_s22, 3 }
   0xe   : > { %s836_s29 = scalar_select %p113_p7, %s737_s19, %s115_s25  }
   0xf   : > { %p174_p10 = pnand %p539_p6, %p173_p9 }
  0x10   : > { %v237_v0 = vld [vmem:[%s942_s2] sm:$0xff] (!%p174_p10)  ;;  %v238_v1 = vld [vmem:[%s942_s2 + $0x8] sm:$0xff] (!%p174_p10)  ;;  %v239_v2 = vld [vmem:[%s942_s2 + $0x10] sm:$0xff] (!%p174_p10)  ;;  %vm223_vm0 = vcmask (!%p174_p10), 261120   ;;  %v226_v3 = vlaneseq (!%p174_p10)  ;;  %v751_v4 = vmov (!%p174_p10), 0.0|0.0   ;;  %v752_v7 = vmov (!%p174_p10), 0.0  }
  0x11   : > { %177 = sbr.rel (%p174_p10) target bundleno = 791 (0x317), region = 32  ;;  %593 = vmatprep.subr.bf16.mxu0 (!%p174_p10), %v751_v4  ;;  %v594_v5 = vpack.c.bf16 (!%p174_p10), %v238_v1, %v237_v0  ;;  %v240_v6 = vld [vmem:[%s942_s2 + $0x18] sm:$0xff] (!%p174_p10)  ;;  %224 = vst.msk [vmem:[#allocation2] sm:$0xff] (!%p174_p10), %vm223_vm0, %v752_v7  ;;  %p205_p11 = scmp.lt.s32.totalorder (!%p174_p10), %s741_s20, 1  ;;  %599 = vmatprep.subr.bf16.mxu1 (!%p174_p10), %v751_v4  ;;  %v317_v8 = vld [vmem:[%s943_s3] sm:$0xff] (!%p174_p10)  ;;  %v318_v9 = vld [vmem:[%s943_s3 + $0x8] sm:$0xff] (!%p174_p10) }
  0x12   : > { %s542_s12 = sshll.u32 (!%p174_p10), %s741_s20, 3  ;;  %vm753_vm1 = vmmov (!%p174_p10), 0   ;;  %v227_v10 = vshrl.u32 (!%p174_p10), %v226_v3, 7  ;;  %s230_s0 = sld [smem:[#allocation4]] (!%p174_p10)  ;;  %v600_v12 = vpack.c.bf16 (!%p174_p10), %v318_v9, %v317_v8  ;;  %v319_v13 = vld [vmem:[%s943_s3 + $0x10] sm:$0xff] (!%p174_p10)  ;;  %v320_v14 = vld [vmem:[%s943_s3 + $0x18] sm:$0xff] (!%p174_p10)  ;;  %v597_v15 = vpack.c.bf16 (!%p174_p10), %v240_v6, %v239_v2 }
  0x13   : > { %571 = vmatprep.mubr.msk.f32.mxu0 (!%p174_p10), %vm753_vm1, %v752_v7  ;;  %v228_v11 = vstv (!%p174_p10), %s542_s12  ;;  %590 = vmatprep.mubr.msk.f32.mxu1 (!%p174_p10), %vm753_vm1, %v752_v7  ;;  %v603_v16 = vpack.c.bf16 (!%p174_p10), %v320_v14, %v319_v13  ;;  %v321_v18 = vld [vmem:[%s943_s3 + $0x20] sm:$0xff] (!%p174_p10)  ;;  %v322_v19 = vld [vmem:[%s943_s3 + $0x28] sm:$0xff] (!%p174_p10)  ;;  %v323_v24 = vld [vmem:[%s943_s3 + $0x30] sm:$0xff] (!%p174_p10)  ;;  %vm325_vm3 = vcmask (!%p174_p10), 523264   ;;  %s546_s27 = sshll.u32 (!%p174_p10), %s741_s20, 7 }
  0x14   : > { %595 = vmatpush3.bf16.msra.mxu0 (!%p174_p10), %v594_v5  ;;  %601 = vmatpush3.bf16.msra.mxu1 (!%p174_p10), %v600_v12  ;;  %v229_v17 = vadd.s32 (!%p174_p10), %v228_v11, %v227_v10  ;;  %v606_v22 = vpack.c.bf16 (!%p174_p10), %v322_v19, %v321_v18  ;;  %v324_v25 = vld [vmem:[%s943_s3 + $0x38] sm:$0xff] (!%p174_p10)  ;;  %s892_s8 = scalar_lea.hbm (!%p174_p10), %s944_s4, %s546_s27 }
  0x15   : > { %596 = vmatprep.subr.bf16.mxu0 (!%p174_p10), %v751_v4  ;;  %602 = vmatprep.subr.bf16.mxu1 (!%p174_p10), %v751_v4  ;;  %v609_v26 = vpack.c.bf16 (!%p174_p10), %v324_v25, %v323_v24 }
  0x18   : > { %s206_s5 = scalar_select %p205_p11, %s741_s20, 1  ;;  %598 = vmatpush3.bf16.msra.mxu0 %v597_v15  ;;  %v231_v21 = vstv %s230_s0  ;;  %604 = vmatpush3.bf16.msra.mxu1 %v603_v16  ;;  %v316_v30 = vld [vmem:[#allocation2] sm:$0xff] }
  0x19   : > { %vm232_vm2 = vcmp.lt.s32.totalorder %v229_v17, %v231_v21  ;;  %605 = vmatprep.subr.bf16.mxu1 %v751_v4  ;;  %s202_s0 = sand.u32 1, %s733_s18   ;;  %s754_s20 = smov [#allocation5]  }
  0x1a   : > { %s541_s6 = sshll.u32 %s206_s5, 3  ;;  %s540_s25 = sshll.u32 %s202_s0, 3 }
  0x1b   : > { %s208_s13 = scalar_lea.vmem %s941_s1, %s541_s6  ;;  %s204_s30 = scalar_lea.vmem [#allocation5], %s540_s25 }
  0x1c   : > { %v233_v20 = vld [vmem:[%s208_s13] sm:$0xff]  ;;  %607 = vmatpush3.bf16.msra.mxu1 %v606_v22  ;;  %s436_s5 = sshll.u32 %s204_s30, 4  ;;  %s423_s9 = scalar_lea.sflag [#allocation6], %s202_s0  ;;  %s894_s5 = int_to_ptr.vmem [resolvable:$true] %s436_s5 }
  0x1d   : > { %v236_v23 = vsel %vm232_vm2, %v233_v20, 0.0  ;;  %608 = vmatprep.subr.bf16.mxu1 %v751_v4  ;;  %s671_s10 = scalar_lea.vmem %s894_s5, 128  ;;  %s675_s11 = sshll.u32 %s754_s20, 4  ;;  %s676_s11 = int_to_ptr.vmem [resolvable:$false] %s675_s11 }
  0x1e   : > { %572 = vmatmul.mubr.msk.f32.vlgmr.msra.gmra.mrb[0].mxu0 %vm223_vm0, %v236_v23  ;;  %p672_p12 = scmp.ne.s32.totalorder %s894_s5, %s671_s10  ;;  %s677_s12 = scalar_lea.vmem %s676_s11, 256 }
  0x1f   : > { %p678_p1 = scmp.lt.s32.totalorder %s894_s5, %s676_s11  ;;  %p679_p2 = scmp.lt.s32.totalorder %s677_s12, %s671_s10 }
  0x20   : > { %610 = vmatpush3.bf16.msra.mxu1 %v609_v26  ;;  %p673_p13 = pnand %p672_p12, %p823_p4 }
  0x21   : > { %p680_p3 = por %p679_p2, %p678_p1 }
  0x22   : > { %p674_p0 = pneg %p673_p13 }
  0x24   : > { %p681_p5 = pnand %p680_p3, %p674_p0 }
  0xf1   : > { %v311_v27 = vpop.f32.mrb[0].mxu0 }
  0xf2   : > { %v315_v28 = vmax.f32 %v311_v27, 0.0  ;;  %v573_v29 = vpop.f32.mrb[1].mxu0 }
  0xf4   : > { %591 = vmatmul.mubr.msk.f32.vlgmr.msra.gmra.mrb[0].mxu1 %vm325_vm3, %v315_v28 }
 0x1c7   : > { %v395_v31 = vpop.f32.mrb[0].mxu1 }
 0x1c8   : > { %v399_v32 = vadd.f32 %v395_v31, %v316_v30  ;;  %v592_v33 = vpop.f32.mrb[1].mxu1 }
 0x1ca   : > { %400 = vst.msk [vmem:[#allocation2] sm:$0xff] %vm223_vm0, %v399_v32 }
 0x1d1   : > { %v404_v34 = vld [vmem:[#allocation2] sm:$0xff] }
 0x1d2   : > { %v406_v35 = vadd.f32 %v404_v34, %v233_v20 }
 0x1d4   : > { %v407_v36 = vsel %vm223_vm0, %v406_v35, 0.0 }
 0x1d5   : > { %408 = vadd.xlane.f32.xlu0 %v407_v36 }
 0x262   : > { %v409_v37 = vpop.xlane.xlu0 %408 }
 0x263   : > { %v411_v38 = vmul.f32 0.03125, %v409_v37 }
 0x265   : > { %v412_v39 = vsub.f32 %v406_v35, %v411_v38 }
 0x267   : > { %v413_v40 = vmul.f32 %v412_v39, %v412_v39 }
 0x269   : > { %v414_v41 = vsel %vm223_vm0, %v413_v40, 0.0 }
 0x26a   : > { %415 = vadd.xlane.f32.xlu0 %v414_v41 }
 0x2f7   : > { %v416_v42 = vpop.xlane.xlu0 %415 }
 0x2f8   : > { %v417_v43 = vmul.f32 0.03125, %v416_v42 }
 0x2fa   : > { %v418_v44 = vadd.f32 1e-05, %v417_v43 }
 0x2fc   : > { %669 = vrsqrt.f32 %v418_v44 }
 0x306   : > { %v670_v45 = vpop.eup %669 }
 0x307   : > { %v420_v46 = vmul.f32 %v670_v45, %v412_v39 }
 0x309   : > { %421 = vst.msk [vmem:[%s204_s30] sm:$0xff] %vm223_vm0, %v420_v46 }
 0x30a   : > { %684 = shalt.err (!%p681_p5)
}
 0x30b   : > { %s685_s13 = scalar_lea.hbm %s892_s8, 128  ;;  %s689_s16 = scalar_lea.hbm %s944_s4, 256 }
 0x30c   : > { %p686_p6 = scmp.ne.s32.totalorder %s892_s8, %s685_s13  ;;  %p690_p10 = scmp.lt.u32.totalorder %s892_s8, %s944_s4 }
 0x30d   : > { %p691_p11 = scmp.lt.u32.totalorder %s689_s16, %s685_s13  ;;  %p693_p13 = scmp.lt.u32.totalorder %s685_s13, %s892_s8 }
 0x30e   : > { %p687_p7 = pnand %p686_p6, %p823_p4 }
 0x30f   : > { %p692_p12 = por %p691_p11, %p690_p10 }
 0x310   : > { %p688_p9 = pneg %p687_p7 }
 0x311   : > { %p694_p0 = por %p693_p13, %p692_p12 }
 0x313   : > { %p695_p1 = pnand %p694_p0, %p688_p9 }
 0x315   : > { %698 = shalt.err (!%p695_p1)
}
 0x316   : > { %611 = dma.vmem_to_hbm [thread:$0]  (%p823_p4), %s894_s5, 128, %s892_s8, %s423_s9  }
 0x317 PF: > { %p617_p2 = scmp.ge.s32.totalorder %s749_s22, 2  ;;  %s448_s25 = sand.u32 1, %s729_s17  }
 0x318   : > { %s449_s27 = scalar_lea.sflag [#allocation6], %s448_s25 }
 0x319   : > { %p614_p3 = pnand %p617_p2, %p830_p8 }
 0x31b   : > { %724 = dma.done.wait (!%p614_p3), %s449_s27, 128  }
 0x31c   : > { %726 = vsyncadd (!%p614_p3), %s449_s27, 4294967168  ;;  %s18_s22 = sadd.s32 1, %s749_s22   ;;  %s947_s17 = smov %s733_s18 }
 0x31d   : > { %p15_p5 = scmp.ge.s32.totalorder %s18_s22, 4   ;;  %s948_s18 = smov %s737_s19 }
 0x31e   : > { %s949_s19 = smov %s836_s29  ;;  %s950_s20 = smov %s745_s21 }
 0x31f   : > { %s951_s21 = smov %s953_s24  ;;  %17 = sbr.rel (!%p15_p5) target bundleno = 6 (0x6), region = 81 }
 0x326   :  { %454 = vsyncpa [#allocation6], 1 }
 0x327   :  { %456 = vsyncpa [#allocation6 + $0x1], 1 }

// kernel: tpu_custom_call.1
= control target key start
LH: loop header
LB: loop body
LE: loop exit
PB: predicated region body
PF: predicated region fallthrough
CT: control target
= control target key end

     0   :  { %s940_s0 = inlined_call_operand.<no memory space> [shape: s32[1], index: 0, kind: input, shape index: {}]   ;;  %s941_s1 = inlined_call_operand.vmem [shape: f32[16,32], index: 1, kind: input, shape index: {}]   ;;  %s942_s2 = inlined_call_operand.vmem [shape: f32[32,64], index: 2, kind: input, shape index: {}]   ;;  %s943_s3 = inlined_call_operand.vmem [shape: f32[64,32], index: 3, kind: input, shape index: {}]   ;;  %s944_s4 = inlined_call_operand.hbm [shape: f32[16,32], index: 4, kind: output, shape index: {}]  }
   0x1   :  { %9 = sst [smem:[#allocation4]] %s940_s0 }
   0x2   :  { %10 = vsyncpa [#allocation6], 0 }
   0x3   :  { %12 = vsyncpa [#allocation6 + $0x1], 0  ;;  %s783_s17 = smov 0   ;;  %s785_s18 = smov 0  }
   0x4   :  { %s787_s19 = smov 0   ;;  %s789_s20 = smov 0  }
   0x5   :  { %s791_s21 = smov 0   ;;  %s793_s22 = smov 0  }
   0x6 LB: > { %s533_s0 = sadd.s32 4294967295, %s749_s22   ;;  %s534_s23 = sadd.s32 4294967294, %s749_s22   ;;  %s749_s22 = sphi %s793_s22, %s18_s22   ;;  %s745_s21 = sphi %s791_s21, %s951_s21   ;;  %s741_s20 = sphi %s789_s20, %s950_s20   ;;  %s737_s19 = sphi %s787_s19, %s949_s19   ;;  %s733_s18 = sphi %s785_s18, %s948_s18   ;;  %s729_s17 = sphi %s783_s17, %s947_s17  }
   0x7   : > { %s30_s24 = sadd.s32 1, %s745_s21  ;;  %s115_s25 = sadd.s32 1, %s737_s19 }
   0x8   : > { %p32_p0 = scmp.ge.s32.totalorder %s30_s24, 2  ;;  %p125_p1 = scmp.ne.s32.totalorder %s737_s19, %s733_s18 }
   0x9   : > { %p126_p2 = scmp.eq.s32.totalorder %s533_s0, 1  ;;  %p131_p3 = scmp.ne.s32.totalorder %s733_s18, %s729_s17 }
   0xa   : > { %s953_s24 = smov (%p32_p0, %s30_s24), 0  ;;  %p132_p5 = scmp.eq.s32.totalorder %s534_s23, 1 }
   0xb   : > { %p823_p4 = por %p126_p2, %p125_p1  ;;  %s112_s27 = ssub.s32 %s745_s21, %s953_s24 }
   0xc   : > { %p539_p6 = scmp.ge.s32.totalorder %s749_s22, 1  ;;  %p113_p7 = scmp.eq.s32.totalorder %s112_s27, 0 }
   0xd   : > { %p830_p8 = por %p132_p5, %p131_p3  ;;  %p173_p9 = scmp.lt.s32.totalorder %s749_s22, 3 }
   0xe   : > { %s836_s29 = scalar_select %p113_p7, %s737_s19, %s115_s25  }
   0xf   : > { %p174_p10 = pnand %p539_p6, %p173_p9 }
  0x10   : > { %v237_v0 = vld [vmem:[%s942_s2] sm:$0xff] (!%p174_p10)  ;;  %v238_v1 = vld [vmem:[%s942_s2 + $0x8] sm:$0xff] (!%p174_p10)  ;;  %v239_v2 = vld [vmem:[%s942_s2 + $0x10] sm:$0xff] (!%p174_p10)  ;;  %vm223_vm0 = vcmask (!%p174_p10), 261120   ;;  %v226_v3 = vlaneseq (!%p174_p10)  ;;  %v751_v4 = vmov (!%p174_p10), 0.0|0.0   ;;  %v752_v7 = vmov (!%p174_p10), 0.0  }
  0x11   : > { %177 = sbr.rel (%p174_p10) target bundleno = 791 (0x317), region = 32  ;;  %593 = vmatprep.subr.bf16.mxu0 (!%p174_p10), %v751_v4  ;;  %v594_v5 = vpack.c.bf16 (!%p174_p10), %v238_v1, %v237_v0  ;;  %v240_v6 = vld [vmem:[%s942_s2 + $0x18] sm:$0xff] (!%p174_p10)  ;;  %224 = vst.msk [vmem:[#allocation2] sm:$0xff] (!%p174_p10), %vm223_vm0, %v752_v7  ;;  %p205_p11 = scmp.lt.s32.totalorder (!%p174_p10), %s741_s20, 1  ;;  %599 = vmatprep.subr.bf16.mxu1 (!%p174_p10), %v751_v4  ;;  %v317_v8 = vld [vmem:[%s943_s3] sm:$0xff] (!%p174_p10)  ;;  %v318_v9 = vld [vmem:[%s943_s3 + $0x8] sm:$0xff] (!%p174_p10) }
  0x12   : > { %s542_s12 = sshll.u32 (!%p174_p10), %s741_s20, 3  ;;  %vm753_vm1 = vmmov (!%p174_p10), 0   ;;  %v227_v10 = vshrl.u32 (!%p174_p10), %v226_v3, 7  ;;  %s230_s0 = sld [smem:[#allocation4]] (!%p174_p10)  ;;  %v600_v12 = vpack.c.bf16 (!%p174_p10), %v318_v9, %v317_v8  ;;  %v319_v13 = vld [vmem:[%s943_s3 + $0x10] sm:$0xff] (!%p174_p10)  ;;  %v320_v14 = vld [vmem:[%s943_s3 + $0x18] sm:$0xff] (!%p174_p10)  ;;  %v597_v15 = vpack.c.bf16 (!%p174_p10), %v240_v6, %v239_v2 }
  0x13   : > { %571 = vmatprep.mubr.msk.f32.mxu0 (!%p174_p10), %vm753_vm1, %v752_v7  ;;  %v228_v11 = vstv (!%p174_p10), %s542_s12  ;;  %590 = vmatprep.mubr.msk.f32.mxu1 (!%p174_p10), %vm753_vm1, %v752_v7  ;;  %v603_v16 = vpack.c.bf16 (!%p174_p10), %v320_v14, %v319_v13  ;;  %v321_v18 = vld [vmem:[%s943_s3 + $0x20] sm:$0xff] (!%p174_p10)  ;;  %v322_v19 = vld [vmem:[%s943_s3 + $0x28] sm:$0xff] (!%p174_p10)  ;;  %v323_v24 = vld [vmem:[%s943_s3 + $0x30] sm:$0xff] (!%p174_p10)  ;;  %vm325_vm3 = vcmask (!%p174_p10), 523264   ;;  %s546_s27 = sshll.u32 (!%p174_p10), %s741_s20, 7 }
  0x14   : > { %595 = vmatpush3.bf16.msra.mxu0 (!%p174_p10), %v594_v5  ;;  %601 = vmatpush3.bf16.msra.mxu1 (!%p174_p10), %v600_v12  ;;  %v229_v17 = vadd.s32 (!%p174_p10), %v228_v11, %v227_v10  ;;  %v606_v22 = vpack.c.bf16 (!%p174_p10), %v322_v19, %v321_v18  ;;  %v324_v25 = vld [vmem:[%s943_s3 + $0x38] sm:$0xff] (!%p174_p10)  ;;  %s892_s8 = scalar_lea.hbm (!%p174_p10), %s944_s4, %s546_s27 }
  0x15   : > { %596 = vmatprep.subr.bf16.mxu0 (!%p174_p10), %v751_v4  ;;  %602 = vmatprep.subr.bf16.mxu1 (!%p174_p10), %v751_v4  ;;  %v609_v26 = vpack.c.bf16 (!%p174_p10), %v324_v25, %v323_v24 }
  0x18   : > { %s206_s5 = scalar_select %p205_p11, %s741_s20, 1  ;;  %598 = vmatpush3.bf16.msra.mxu0 %v597_v15  ;;  %v231_v21 = vstv %s230_s0  ;;  %604 = vmatpush3.bf16.msra.mxu1 %v603_v16  ;;  %v316_v30 = vld [vmem:[#allocation2] sm:$0xff] }
  0x19   : > { %vm232_vm2 = vcmp.lt.s32.totalorder %v229_v17, %v231_v21  ;;  %605 = vmatprep.subr.bf16.mxu1 %v751_v4  ;;  %s202_s0 = sand.u32 1, %s733_s18   ;;  %s754_s20 = smov [#allocation5]  }
  0x1a   : > { %s541_s6 = sshll.u32 %s206_s5, 3  ;;  %s540_s25 = sshll.u32 %s202_s0, 3 }
  0x1b   : > { %s208_s13 = scalar_lea.vmem %s941_s1, %s541_s6  ;;  %s204_s30 = scalar_lea.vmem [#allocation5], %s540_s25 }
  0x1c   : > { %v233_v20 = vld [vmem:[%s208_s13] sm:$0xff]  ;;  %607 = vmatpush3.bf16.msra.mxu1 %v606_v22  ;;  %s436_s5 = sshll.u32 %s204_s30, 4  ;;  %s423_s9 = scalar_lea.sflag [#allocation6], %s202_s0  ;;  %s894_s5 = int_to_ptr.vmem [resolvable:$true] %s436_s5 }
  0x1d   : > { %v236_v23 = vsel %vm232_vm2, %v233_v20, 0.0  ;;  %608 = vmatprep.subr.bf16.mxu1 %v751_v4  ;;  %s671_s10 = scalar_lea.vmem %s894_s5, 128  ;;  %s675_s11 = sshll.u32 %s754_s20, 4  ;;  %s676_s11 = int_to_ptr.vmem [resolvable:$false] %s675_s11 }
  0x1e   : > { %572 = vmatmul.mubr.msk.f32.vlgmr.msra.gmra.mrb[0].mxu0 %vm223_vm0, %v236_v23  ;;  %p672_p12 = scmp.ne.s32.totalorder %s894_s5, %s671_s10  ;;  %s677_s12 = scalar_lea.vmem %s676_s11, 256 }
  0x1f   : > { %p678_p1 = scmp.lt.s32.totalorder %s894_s5, %s676_s11  ;;  %p679_p2 = scmp.lt.s32.totalorder %s677_s12, %s671_s10 }
  0x20   : > { %610 = vmatpush3.bf16.msra.mxu1 %v609_v26  ;;  %p673_p13 = pnand %p672_p12, %p823_p4 }
  0x21   : > { %p680_p3 = por %p679_p2, %p678_p1 }
  0x22   : > { %p674_p0 = pneg %p673_p13 }
  0x24   : > { %p681_p5 = pnand %p680_p3, %p674_p0 }
  0xf1   : > { %v311_v27 = vpop.f32.mrb[0].mxu0 }
  0xf2   : > { %v315_v28 = vmax.f32 %v311_v27, 0.0  ;;  %v573_v29 = vpop.f32.mrb[1].mxu0 }
  0xf4   : > { %591 = vmatmul.mubr.msk.f32.vlgmr.msra.gmra.mrb[0].mxu1 %vm325_vm3, %v315_v28 }
 0x1c7   : > { %v395_v31 = vpop.f32.mrb[0].mxu1 }
 0x1c8   : > { %v399_v32 = vadd.f32 %v395_v31, %v316_v30  ;;  %v592_v33 = vpop.f32.mrb[1].mxu1 }
 0x1ca   : > { %400 = vst.msk [vmem:[#allocation2] sm:$0xff] %vm223_vm0, %v399_v32 }
 0x1d1   : > { %v404_v34 = vld [vmem:[#allocation2] sm:$0xff] }
 0x1d2   : > { %v406_v35 = vadd.f32 %v404_v34, %v233_v20 }
 0x1d4   : > { %v407_v36 = vsel %vm223_vm0, %v406_v35, 0.0 }
 0x1d5   : > { %408 = vadd.xlane.f32.xlu0 %v407_v36 }
 0x262   : > { %v409_v37 = vpop.xlane.xlu0 %408 }
 0x263   : > { %v411_v38 = vmul.f32 0.03125, %v409_v37 }
 0x265   : > { %v412_v39 = vsub.f32 %v406_v35, %v411_v38 }
 0x267   : > { %v413_v40 = vmul.f32 %v412_v39, %v412_v39 }
 0x269   : > { %v414_v41 = vsel %vm223_vm0, %v413_v40, 0.0 }
 0x26a   : > { %415 = vadd.xlane.f32.xlu0 %v414_v41 }
 0x2f7   : > { %v416_v42 = vpop.xlane.xlu0 %415 }
 0x2f8   : > { %v417_v43 = vmul.f32 0.03125, %v416_v42 }
 0x2fa   : > { %v418_v44 = vadd.f32 1e-05, %v417_v43 }
 0x2fc   : > { %669 = vrsqrt.f32 %v418_v44 }
 0x306   : > { %v670_v45 = vpop.eup %669 }
 0x307   : > { %v420_v46 = vmul.f32 %v670_v45, %v412_v39 }
 0x309   : > { %421 = vst.msk [vmem:[%s204_s30] sm:$0xff] %vm223_vm0, %v420_v46 }
 0x30a   : > { %684 = shalt.err (!%p681_p5)
}
 0x30b   : > { %s685_s13 = scalar_lea.hbm %s892_s8, 128  ;;  %s689_s16 = scalar_lea.hbm %s944_s4, 256 }
 0x30c   : > { %p686_p6 = scmp.ne.s32.totalorder %s892_s8, %s685_s13  ;;  %p690_p10 = scmp.lt.u32.totalorder %s892_s8, %s944_s4 }
 0x30d   : > { %p691_p11 = scmp.lt.u32.totalorder %s689_s16, %s685_s13  ;;  %p693_p13 = scmp.lt.u32.totalorder %s685_s13, %s892_s8 }
 0x30e   : > { %p687_p7 = pnand %p686_p6, %p823_p4 }
 0x30f   : > { %p692_p12 = por %p691_p11, %p690_p10 }
 0x310   : > { %p688_p9 = pneg %p687_p7 }
 0x311   : > { %p694_p0 = por %p693_p13, %p692_p12 }
 0x313   : > { %p695_p1 = pnand %p694_p0, %p688_p9 }
 0x315   : > { %698 = shalt.err (!%p695_p1)
}
 0x316   : > { %611 = dma.vmem_to_hbm [thread:$0]  (%p823_p4), %s894_s5, 128, %s892_s8, %s423_s9  }
 0x317 PF: > { %p617_p2 = scmp.ge.s32.totalorder %s749_s22, 2  ;;  %s448_s25 = sand.u32 1, %s729_s17  }
 0x318   : > { %s449_s27 = scalar_lea.sflag [#allocation6], %s448_s25 }
 0x319   : > { %p614_p3 = pnand %p617_p2, %p830_p8 }
 0x31b   : > { %724 = dma.done.wait (!%p614_p3), %s449_s27, 128  }
 0x31c   : > { %726 = vsyncadd (!%p614_p3), %s449_s27, 4294967168  ;;  %s18_s22 = sadd.s32 1, %s749_s22   ;;  %s947_s17 = smov %s733_s18 }
 0x31d   : > { %p15_p5 = scmp.ge.s32.totalorder %s18_s22, 4   ;;  %s948_s18 = smov %s737_s19 }
 0x31e   : > { %s949_s19 = smov %s836_s29  ;;  %s950_s20 = smov %s745_s21 }
 0x31f   : > { %s951_s21 = smov %s953_s24  ;;  %17 = sbr.rel (!%p15_p5) target bundleno = 6 (0x6), region = 81 }
 0x326   :  { %454 = vsyncpa [#allocation6], 1 }
 0x327   :  { %456 = vsyncpa [#allocation6 + $0x1], 1 }

</bundles_post_ra>
